<compile_context>
chip_gen: v7x
topology: tpu7x:2x2x1
jax: 0.10.0
libtpu: 0.0.40
codegen_flags: <defaults>
</compile_context>

<pallas_src>
import functools

import jax
import jax.numpy as jnp
from jax.experimental import pallas as pl
from jax.experimental.pallas import tpu as pltpu

BN_EPS = 1e-5          # PyTorch nn.BatchNorm2d default
_DEF_TM = 256          # default M-tile (multiple of 8; >=256 keeps v6e/v7x MXU busy)


def _round_up(x, m):
    return (x + m - 1) // m * m


def _vmem_limit(est_bytes):
    """Right-sized scoped-VMEM request: estimate + margin, capped for v7x (64 MiB)."""
    return int(min(48 * 1024 * 1024, max(est_bytes + 4 * 1024 * 1024, 16 * 1024 * 1024)))


# ----------------------------------------------------------------------------
# Kernel 1: gridded fused matmul + folded-BN epilogue (1x1 convs, conv1 im2col, head)
# ----------------------------------------------------------------------------
def _matmul_bn_kernel(x_ref, w_ref, scale_ref, bias_ref, o_ref, *, relu):
    acc = jnp.dot(x_ref[...], w_ref[...], preferred_element_type=jnp.float32)
    acc = acc * scale_ref[...] + bias_ref[...]
    if relu:
        acc = jnp.maximum(acc, 0.0)
    o_ref[...] = acc.astype(o_ref.dtype)


def matmul_bn(x, w, scale, bias, *, relu, tm=_DEF_TM):
    """maybe_relu((x @ w) * scale + bias), gridded over rows of x (M-parallel)."""
    m, k = x.shape
    k2, cout = w.shape
    assert k == k2
    tm = min(tm, _round_up(m, 8))
    m_pad = _round_up(m, tm)
    if m_pad != m:
        x = jnp.pad(x, ((0, m_pad - m), (0, 0)))
    x = x.astype(jnp.bfloat16)                        # bf16 MXU inputs, f32 accumulation

    est_bytes = (2 * tm * k * 2 + k * cout * 2 + 2 * tm * cout * 4 + 2 * cout * 4)
    out = pl.pallas_call(
        functools.partial(_matmul_bn_kernel, relu=relu),
        grid=(m_pad // tm,),
        in_specs=[
            pl.BlockSpec((tm, k), lambda i: (i, 0)),
            pl.BlockSpec((k, cout), lambda i: (0, 0)),     # weights resident
            pl.BlockSpec((1, cout), lambda i: (0, 0)),
            pl.BlockSpec((1, cout), lambda i: (0, 0)),
        ],
        out_specs=pl.BlockSpec((tm, cout), lambda i: (i, 0)),
        out_shape=jax.ShapeDtypeStruct((m_pad, cout), jnp.float32),
        compiler_params=pltpu.CompilerParams(
            dimension_semantics=("parallel",),
            vmem_limit_bytes=_vmem_limit(est_bytes)),
        cost_estimate=pl.CostEstimate(
            flops=int(2 * m_pad * k * cout),
            transcendentals=0,
            bytes_accessed=int(m_pad * k * 2 + k * cout * 2 + m_pad * cout * 4)),
    )(x, w, scale, bias)
    return out[:m] if m_pad != m else out


# ----------------------------------------------------------------------------
# Kernel 2: direct 3x3 conv + folded BN [+ residual] [+ ReLU]
# (no im2col; 9 flat-shifted matmuls over the padded, flattened activation)
# ----------------------------------------------------------------------------
def _conv3x3_body(x_ref, w_ref, scale_ref, bias_ref, res_ref, o_ref, *, wp, relu):
    tm, cout = o_ref.shape
    i = pl.program_id(0)
    base = pl.multiple_of(i * tm, 8)
    acc = jnp.zeros((tm, cout), jnp.float32)
    for kh in range(3):
        for kw in range(3):
            # Uniform flat shift of the zero-padded, row-major flattened activation.
            tap = x_ref[pl.ds(base + kh * wp + kw, tm), :].astype(jnp.bfloat16)
            acc = acc + jnp.dot(tap, w_ref[kh * 3 + kw],
                                preferred_element_type=jnp.float32)
    acc = acc * scale_ref[...] + bias_ref[...]
    if res_ref is not None:
        acc = acc + res_ref[...]
    if relu:
        acc = jnp.maximum(acc, 0.0)
    o_ref[...] = acc.astype(o_ref.dtype)


def _conv3x3_kernel(x_ref, w_ref, scale_ref, bias_ref, o_ref, *, wp, relu):
    _conv3x3_body(x_ref, w_ref, scale_ref, bias_ref, None, o_ref, wp=wp, relu=relu)


def _conv3x3_res_kernel(x_ref, w_ref, scale_ref, bias_ref, res_ref, o_ref, *, wp, relu):
    _conv3x3_body(x_ref, w_ref, scale_ref, bias_ref, res_ref, o_ref, wp=wp, relu=relu)


def conv3x3_bn(x, w9, scale, bias, *, stride, relu, res=None, tm=_DEF_TM):
    """3x3 conv (padding=1) + folded BN [+ residual] [+ ReLU], NHWC in/out, f32.

    x:   (N, H, W, Cin) f32;  w9: (9, Cin, Cout) bf16 taps ordered kh*3+kw.
    The kernel always evaluates the stride-1 "same" convolution on the zero-padded,
    flattened activation; stride-2 outputs are subsampled on the wrapper side.
    """
    n, h, w_sp, cin = x.shape
    cout = w9.shape[-1]
    assert res is None or stride == 1

    hp, wp = h + 2, w_sp + 2
    x_pad = jnp.pad(x.astype(jnp.float32), ((0, 0), (1, 1), (1, 1), (0, 0)))
    x_flat = x_pad.reshape(n * hp * wp, cin)

    m_valid = n * hp * wp                      # rows at which the conv is evaluated
    tm = min(tm, _round_up(m_valid, 8))
    m_out = _round_up(m_valid, tm)
    halo = 2 * wp + 2                          # max flat tap shift
    rx = m_out + halo
    x_flat = jnp.pad(x_flat, ((0, rx - m_valid), (0, 0)))

    kernel_args = [x_flat, w9, scale, bias]
    in_specs = [
        pl.BlockSpec((rx, cin), lambda i: (0, 0)),           # activation resident (1 DMA)
        pl.BlockSpec((9, cin, cout), lambda i: (0, 0, 0)),   # weights resident
        pl.BlockSpec((1, cout), lambda i: (0, 0)),
        pl.BlockSpec((1, cout), lambda i: (0, 0)),
    ]
    if res is None:
        kernel = functools.partial(_conv3x3_kernel, wp=wp, relu=relu)
    else:
        res_pad = jnp.pad(res.astype(jnp.float32),
                          ((0, 0), (0, hp - h), (0, wp - w_sp), (0, 0)))
        res_flat = jnp.pad(res_pad.reshape(m_valid, cout),
                           ((0, m_out - m_valid), (0, 0)))
        kernel_args.append(res_flat)
        in_specs.append(pl.BlockSpec((tm, cout), lambda i: (i, 0)))
        kernel = functools.partial(_conv3x3_res_kernel, wp=wp, relu=relu)

    est_bytes = (rx * cin * 4 + 9 * cin * cout * 2 + 4 * tm * cout * 4
                 + (4 * tm * cout * 4 if res is not None else 0) + 4 * cout * 4)
    out_flat = pl.pallas_call(
        kernel,
        grid=(m_out // tm,),
        in_specs=in_specs,
        out_specs=pl.BlockSpec((tm, cout), lambda i: (i, 0)),
        out_shape=jax.ShapeDtypeStruct((m_out, cout), jnp.float32),
        compiler_params=pltpu.CompilerParams(
            dimension_semantics=("parallel",),
            vmem_limit_bytes=_vmem_limit(est_bytes)),
        cost_estimate=pl.CostEstimate(
            flops=int(2 * m_out * 9 * cin * cout),
            transcendentals=0,
            bytes_accessed=int(rx * cin * 4 + 9 * cin * cout * 2 + m_out * cout * 4)),
    )(*kernel_args)

    out = out_flat[:m_valid].reshape(n, hp, wp, cout)
    return out[:, 0:h:stride, 0:w_sp:stride, :]


# ----------------------------------------------------------------------------
# Host-side glue
# ----------------------------------------------------------------------------
def _im2col3x3(x, stride):
    """Used only for conv1 (Cin=1, so the '9x' expansion is 9 tiny channels)."""
    x = jnp.pad(x, ((0, 0), (1, 1), (1, 1), (0, 0)))
    n, hp, wp, c = x.shape
    ho = (hp - 3) // stride + 1
    wo = (wp - 3) // stride + 1
    cols = [x[:, kh:kh + stride * ho:stride, kw:kw + stride * wo:stride, :]
            for kh in range(3) for kw in range(3)]
    cols = jnp.concatenate(cols, axis=-1)
    return cols.reshape(n * ho * wo, 9 * c), (n, ho, wo)


def conv1x1_bn(x, w, scale, bias, *, stride, relu=False):
    if stride > 1:
        x = x[:, ::stride, ::stride, :]
    n, ho, wo, cin = x.shape
    out = matmul_bn(x.reshape(n * ho * wo, cin), w, scale, bias, relu=relu)
    return out.reshape(n, ho, wo, -1)


def fold_bn(bn):
    scale = bn["gamma"] / jnp.sqrt(bn["var"] + BN_EPS)
    bias = bn["beta"] - bn["mean"] * scale
    return (scale.reshape(1, -1).astype(jnp.float32),
            bias.reshape(1, -1).astype(jnp.float32))


def prepare_params(params):
    """One-time preprocessing: fold eval-mode BN, reshape weights to kernel layouts,
    cast MXU operands to bf16, and fold the 4x4 avg-pool into the Linear weight."""
    def w3x3(w):     # (3,3,Cin,Cout) HWIO -> (9, Cin, Cout) bf16, taps kh*3+kw
        return w.reshape(9, w.shape[2], w.shape[3]).astype(jnp.bfloat16)

    s1, b1 = fold_bn(params["bn1"])
    w1 = params["conv1"]
    prepared = dict(
        conv1_w=w1.reshape(9 * w1.shape[2], w1.shape[3]).astype(jnp.bfloat16),
        bn1_scale=s1, bn1_bias=b1)

    for layer in ("layer1", "layer2", "layer3", "layer4"):
        blocks = []
        for blk in params[layer]:
            s1_, b1_ = fold_bn(blk["bn1"])
            s2_, b2_ = fold_bn(blk["bn2"])
            nb = dict(stride=blk["stride"],
                      conv1_w=w3x3(blk["conv1"]), bn1_scale=s1_, bn1_bias=b1_,
                      conv2_w=w3x3(blk["conv2"]), bn2_scale=s2_, bn2_bias=b2_)
            if "conv_sc" in blk:
                ss, bs = fold_bn(blk["bn_sc"])
                wsc = blk["conv_sc"]
                nb["sc_w"] = wsc.reshape(wsc.shape[2], wsc.shape[3]).astype(jnp.bfloat16)
                nb["sc_scale"] = ss
                nb["sc_bias"] = bs
            blocks.append(nb)
        prepared[layer] = blocks

    # F.avg_pool2d(out, 4) + flatten + Linear  ==  (N, 16*512) @ tile(W, 16)/16 + b
    nc = params["linear_w"].shape[1]
    prepared["head_w"] = (jnp.tile(params["linear_w"], (16, 1)) / 16.0).astype(jnp.bfloat16)
    prepared["head_scale"] = jnp.ones((1, nc), jnp.float32)
    prepared["head_bias"] = params["linear_b"].reshape(1, nc).astype(jnp.float32)
    return prepared


# ----------------------------------------------------------------------------
# ResNet forward (BasicBlock, expansion = 1)
# ----------------------------------------------------------------------------
def basic_block(x, p):
    stride = p["stride"]
    out = conv3x3_bn(x, p["conv1_w"], p["bn1_scale"], p["bn1_bias"],
                     stride=stride, relu=True)
    if "sc_w" in p:
        shortcut = conv1x1_bn(x, p["sc_w"], p["sc_scale"], p["sc_bias"],
                              stride=stride, relu=False)
    else:
        shortcut = x
    # out = relu(bn2(conv2(out)) + shortcut) -- residual add + ReLU fused in kernel
    return conv3x3_bn(out, p["conv2_w"], p["bn2_scale"], p["bn2_bias"],
                      stride=1, relu=True, res=shortcut)


def resnet_forward(prepared, x_nchw):
    # layout: input is NCHW (PyTorch); converted to NHWC for the kernels.
    x = jnp.transpose(x_nchw, (0, 2, 3, 1)).astype(jnp.float32)

    cols, (n, ho, wo) = _im2col3x3(x, stride=1)               # Cin=1 -> K=9 only
    out = matmul_bn(cols, prepared["conv1_w"],
                    prepared["bn1_scale"], prepared["bn1_bias"], relu=True)
    out = out.reshape(n, ho, wo, -1)

    for layer in ("layer1", "layer2", "layer3", "layer4"):
        for blk in prepared[layer]:
            out = basic_block(out, blk)

    n_, h_, w_, c_ = out.shape
    assert h_ == 4 and w_ == 4, "F.avg_pool2d(out, 4) expects a 4x4 final feature map"
    feat = out.reshape(n_, h_ * w_ * c_)                      # (N, 16*512)
    return matmul_bn(feat, prepared["head_w"],
                     prepared["head_scale"], prepared["head_bias"], relu=False)


# ----------------------------------------------------------------------------
# Deterministic parameter initialization (shapes from ResNet.__init__ / BasicBlock)
# ----------------------------------------------------------------------------
def init_params(key, in_channels=1, num_classes=2, num_blocks=(2, 2, 2, 2)):
    keys = iter(jax.random.split(key, 256))

    def conv_w(cin, cout, k):
        std = (2.0 / (k * k * cin)) ** 0.5
        return std * jax.random.normal(next(keys), (k, k, cin, cout), jnp.float32)

    def bn(c):
        return dict(gamma=jnp.ones((c,), jnp.float32),
                    beta=jnp.zeros((c,), jnp.float32),
                    mean=jnp.zeros((c,), jnp.float32),
                    var=jnp.ones((c,), jnp.float32))

    params = dict(conv1=conv_w(in_channels, 64, 3), bn1=bn(64))
    inplane = 64
    layer_defs = [(64, num_blocks[0], 1), (128, num_blocks[1], 2),
                  (256, num_blocks[2], 2), (512, num_blocks[3], 2)]
    for li, (planes, nb, stride) in enumerate(layer_defs, start=1):
        blocks = []
        for s in [stride] + [1] * (nb - 1):
            blk = dict(stride=s,
                       conv1=conv_w(inplane, planes, 3), bn1=bn(planes),
                       conv2=conv_w(planes, planes, 3), bn2=bn(planes))
            if s != 1 or inplane != planes:
                blk["conv_sc"] = conv_w(inplane, planes, 1)
                blk["bn_sc"] = bn(planes)
            blocks.append(blk)
            inplane = planes
        params[f"layer{li}"] = blocks

    bound = 1.0 / (512 ** 0.5)
    params["linear_w"] = jax.random.uniform(
        next(keys), (512, num_classes), jnp.float32, -bound, bound)
    params["linear_b"] = jax.random.uniform(
        next(keys), (num_classes,), jnp.float32, -bound, bound)
    return params


if __name__ == "__main__":
    key = jax.random.PRNGKey(0)
    pkey, xkey = jax.random.split(key)

    params = init_params(pkey, in_channels=1, num_classes=2, num_blocks=(2, 2, 2, 2))
    prepared = prepare_params(params)

    # MedMNIST-style input: NCHW, batch=2, 1 channel, 28x28 spatial.
    x = jax.random.normal(xkey, (2, 1, 28, 28), jnp.float32)

    logits = resnet_forward(prepared, x)
    jax.block_until_ready(logits)

    assert logits.shape == (2, 2), logits.shape
    assert bool(jnp.all(jnp.isfinite(logits)))
    print("KERNEL_OK")
</pallas_src>

<mosaic_0001>
module attributes {stable_mosaic.version = 11 : i64} {
  func.func @_matmul_bn_kernel(%arg0: i32, %arg1: memref<256x9xbf16, #tpu.memory_space<vmem>>, %arg2: memref<9x64xbf16, #tpu.memory_space<vmem>>, %arg3: memref<1x64xf32, #tpu.memory_space<vmem>>, %arg4: memref<1x64xf32, #tpu.memory_space<vmem>>, %arg5: memref<256x64xf32, #tpu.memory_space<vmem>>) attributes {dimension_semantics = [#tpu.dimension_semantics<parallel>], iteration_bounds = array<i64: 7>, scalar_prefetch = 0 : i64, scratch_operands = 0 : i64, tpu.core_type = #tpu.core_type<tc>, window_params = [{transform_indices = @transform_0, window_bounds = array<i64: 256, 9>}, {pipeline_mode = #tpu.pipeline_mode<synchronous>, transform_indices = @transform_1, window_bounds = array<i64: 9, 64>}, {pipeline_mode = #tpu.pipeline_mode<synchronous>, transform_indices = @transform_2, window_bounds = array<i64: 1, 64>}, {pipeline_mode = #tpu.pipeline_mode<synchronous>, transform_indices = @transform_3, window_bounds = array<i64: 1, 64>}, {transform_indices = @transform_4, window_bounds = array<i64: 256, 64>}]} {
    %c0 = arith.constant 0 : index
    %c0_0 = arith.constant 0 : index
    %0 = vector.load %arg1[%c0, %c0_0] : memref<256x9xbf16, #tpu.memory_space<vmem>>, vector<256x9xbf16>
    %c0_1 = arith.constant 0 : index
    %c0_2 = arith.constant 0 : index
    %1 = vector.load %arg2[%c0_1, %c0_2] : memref<9x64xbf16, #tpu.memory_space<vmem>>, vector<9x64xbf16>
    %cst = arith.constant dense<0.000000e+00> : vector<256x64xf32>
    %2 = tpu.matmul %0, %1, %cst {dimension_numbers = #tpu.dot_dimension_numbers<[1], [0], [0], [1], [0, 0, 1, 1], [], []>} : vector<256x9xbf16>, vector<9x64xbf16>, vector<256x64xf32> -> vector<256x64xf32>
    %c0_3 = arith.constant 0 : index
    %c0_4 = arith.constant 0 : index
    %3 = vector.load %arg3[%c0_3, %c0_4] : memref<1x64xf32, #tpu.memory_space<vmem>>, vector<1x64xf32>
    %4 = vector.broadcast %3 : vector<1x64xf32> to vector<256x64xf32>
    %5 = arith.mulf %2, %4 : vector<256x64xf32>
    %c0_5 = arith.constant 0 : index
    %c0_6 = arith.constant 0 : index
    %6 = vector.load %arg4[%c0_5, %c0_6] : memref<1x64xf32, #tpu.memory_space<vmem>>, vector<1x64xf32>
    %7 = vector.broadcast %6 : vector<1x64xf32> to vector<256x64xf32>
    %8 = arith.addf %5, %7 : vector<256x64xf32>
    %cst_7 = arith.constant 0.000000e+00 : f32
    %9 = vector.broadcast %cst_7 : f32 to vector<256x64xf32>
    %10 = arith.maximumf %8, %9 : vector<256x64xf32>
    %c0_8 = arith.constant 0 : index
    %c0_9 = arith.constant 0 : index
    %11 = vector.load %arg5[%c0_8, %c0_9] : memref<256x64xf32, #tpu.memory_space<vmem>>, vector<256x64xf32>
    tpu.vector_store %arg5[%c0_8, %c0_9], %10 {strides = array<i32>} : memref<256x64xf32, #tpu.memory_space<vmem>>, vector<256x64xf32>,
    return
  }
  func.func @transform_0(%arg0: i32) -> (i32, i32) {
    %c0_i32 = arith.constant 0 : i32
    %c0_i32_0 = arith.constant 0 : i32
    return %arg0, %c0_i32 : i32, i32
  }
  func.func @transform_1(%arg0: i32) -> (i32, i32) {
    %c0_i32 = arith.constant 0 : i32
    %c0_i32_0 = arith.constant 0 : i32
    %c0_i32_1 = arith.constant 0 : i32
    return %c0_i32, %c0_i32_0 : i32, i32
  }
  func.func @transform_2(%arg0: i32) -> (i32, i32) {
    %c0_i32 = arith.constant 0 : i32
    %c0_i32_0 = arith.constant 0 : i32
    %c0_i32_1 = arith.constant 0 : i32
    return %c0_i32, %c0_i32_0 : i32, i32
  }
  func.func @transform_3(%arg0: i32) -> (i32, i32) {
    %c0_i32 = arith.constant 0 : i32
    %c0_i32_0 = arith.constant 0 : i32
    %c0_i32_1 = arith.constant 0 : i32
    return %c0_i32, %c0_i32_0 : i32, i32
  }
  func.func @transform_4(%arg0: i32) -> (i32, i32) {
    %c0_i32 = arith.constant 0 : i32
    %c0_i32_0 = arith.constant 0 : i32
    return %arg0, %c0_i32 : i32, i32
  }
}

</mosaic_0001>

<bundles_post_ra>
// kernel: tpu_custom_call.1
= control target key start
LH: loop header
LB: loop body
LE: loop exit
PB: predicated region body
PF: predicated region fallthrough
CT: control target
= control target key end

     0   :  { %s896_s15 = smov 0   ;;  %s1094_s0 = inlined_call_operand.vmem [shape: bf16[1792,9], index: 0, kind: input, shape index: {}]   ;;  %s1095_s1 = inlined_call_operand.vmem [shape: bf16[9,64], index: 1, kind: input, shape index: {}]   ;;  %s1096_s2 = inlined_call_operand.vmem [shape: f32[1,64], index: 2, kind: input, shape index: {}]   ;;  %s1097_s3 = inlined_call_operand.vmem [shape: f32[1,64], index: 3, kind: input, shape index: {}]   ;;  %s1098_s4 = inlined_call_operand.vmem [shape: f32[1792,64], index: 4, kind: output, shape index: {}]  }
   0x1 LB: > { %s737_s16 = sadd.s32 4294967295, %s868_s15   ;;  %p741_p0 = scmp.ge.s32.totalorder %s868_s15, 1  ;;  %s868_s15 = sphi %s896_s15, %s14_s15  }
   0x2   : > { %p163_p1 = scmp.lt.s32.totalorder %s868_s15, 8 }
   0x4   : > { %p164_p2 = pnand %p741_p0, %p163_p1 }
   0x5   : > { %v845_v0 = vld [vmem:[%s1095_s1] sm:$0x1f] (!%p164_p2)   ;;  %vm370_vm0 = vcmask (!%p164_p2), 1043456   ;;  %vm371_vm1 = vcmask (!%p164_p2), 1044480   ;;  %s742_s19 = sshll.u32 (!%p164_p2), %s737_s16, 5  ;;  %v870_v1 = vmov (!%p164_p2), 65535  }
   0x6   : > { %167 = sbr.rel (%p164_p2) target bundleno = 265 (0x109), region = 36  ;;  %v372_v2 = vsel (!%p164_p2), %vm370_vm0, 4294967295, %v870_v1  ;;  %p190_p3 = scmp.lt.s32.totalorder (!%p164_p2), %s742_s19, 223  ;;  %vm321_vm2 = vcmask (!%p164_p2), 72704   ;;  %v950_v21 = vld [vmem:[%s1096_s2] ss:$0 sm:$0xff] (!%p164_p2) }
   0x7   : > { %v373_v3 = vsel (!%p164_p2), %vm371_vm1, %v372_v2, 0  ;;  %v955_v23 = vld [vmem:[%s1097_s3] ss:$0 sm:$0xff] (!%p164_p2)  ;;  %vm648_vm3 = vcmask (!%p164_p2), 523264  }
   0x8   : > { %v375_v4 = vand.u32 (!%p164_p2), %v845_v0, %v373_v3 }
   0xa   : > { %800 = vmatprep.subr.bf16.mxu0 (!%p164_p2), %v375_v4  ;;  %834 = vmatprep.subr.bf16.mxu1 (!%p164_p2), %v375_v4 }
   0xb   : > { %801 = vmatpush3.bf16.msra.mxu0 (!%p164_p2), %v375_v4  ;;  %835 = vmatpush3.bf16.msra.mxu1 (!%p164_p2), %v375_v4 }
   0xd   : > { %s1100_s19 = smov (!%p190_p3, %s742_s19), 223 }
   0xe   : > { %s743_s20 = sshll.u32 %s1100_s19, 2  ;;  %s745_s28 = sshll.u32 %s1100_s19, 3 }
   0xf   : > { %s913_s23 = scalar_lea.vmem %s1094_s0, %s743_s20  ;;  %s967_s5 = scalar_lea.vmem %s1098_s4, %s745_s28 }
  0x10   : > { %v846_v5 = vld [vmem:[%s913_s23] sm:$0xff]   ;;  %v848_v7 = vld [vmem:[%s913_s23 + $0x8] sm:$0xff]   ;;  %v850_v9 = vld [vmem:[%s913_s23 + $0x10] sm:$0xff]  }
  0x11   : > { %v847_v6 = vld [vmem:[%s913_s23 + $0x40] sm:$0xff]   ;;  %802 = vmatprep.mubr.msk.bf16.mxu0 %vm321_vm2, %v846_v5  ;;  %v849_v8 = vld [vmem:[%s913_s23 + $0x48] sm:$0xff]   ;;  %v851_v10 = vld [vmem:[%s913_s23 + $0x50] sm:$0xff]  }
  0x12   : > { %818 = vmatprep.mubr.msk.bf16.mxu1 %vm321_vm2, %v847_v6  ;;  %803 = vmatmul.mubr.msk.bf16.vlgmr.msra.gmra.mrb[0].mxu0 %vm321_vm2, %v848_v7  ;;  %v852_v11 = vld [vmem:[%s913_s23 + $0x18] sm:$0xff]   ;;  %v854_v13 = vld [vmem:[%s913_s23 + $0x20] sm:$0xff]   ;;  %v856_v15 = vld [vmem:[%s913_s23 + $0x28] sm:$0xff]  }
  0x13   : > { %819 = vmatmul.mubr.msk.bf16.vlgmr.msra.gmra.mrb[0].mxu1 %vm321_vm2, %v849_v8  ;;  %806 = vmatprep.mubr.msk.bf16.mxu0 %vm321_vm2, %v850_v9  ;;  %v853_v12 = vld [vmem:[%s913_s23 + $0x58] sm:$0xff]   ;;  %v855_v14 = vld [vmem:[%s913_s23 + $0x60] sm:$0xff]   ;;  %v857_v16 = vld [vmem:[%s913_s23 + $0x68] sm:$0xff]  }
  0x14   : > { %822 = vmatprep.mubr.msk.bf16.mxu1 %vm321_vm2, %v851_v10  ;;  %v858_v17 = vld [vmem:[%s913_s23 + $0x30] sm:$0xff]   ;;  %v860_v19 = vld [vmem:[%s913_s23 + $0x38] sm:$0xff]  }
  0x15   : > { %v859_v18 = vld [vmem:[%s913_s23 + $0x70] sm:$0xff]   ;;  %v861_v20 = vld [vmem:[%s913_s23 + $0x78] sm:$0xff]  }
  0x1a   : > { %807 = vmatmul.mubr.msk.bf16.gmra.mrb[4].mxu0 %vm321_vm2, %v852_v11 }
  0x1b   : > { %823 = vmatmul.mubr.msk.bf16.gmra.mrb[4].mxu1 %vm321_vm2, %v853_v12  ;;  %810 = vmatprep.mubr.msk.bf16.mxu0 %vm321_vm2, %v854_v13 }
  0x1c   : > { %826 = vmatprep.mubr.msk.bf16.mxu1 %vm321_vm2, %v855_v14 }
  0x22   : > { %811 = vmatmul.mubr.msk.bf16.gmra.mrb[8].mxu0 %vm321_vm2, %v856_v15 }
  0x23   : > { %827 = vmatmul.mubr.msk.bf16.gmra.mrb[8].mxu1 %vm321_vm2, %v857_v16  ;;  %814 = vmatprep.mubr.msk.bf16.mxu0 %vm321_vm2, %v858_v17 }
  0x24   : > { %830 = vmatprep.mubr.msk.bf16.mxu1 %vm321_vm2, %v859_v18 }
  0x2a   : > { %815 = vmatmul.mubr.msk.bf16.gmra.mrb[12].mxu0 %vm321_vm2, %v860_v19 }
  0x2b   : > { %831 = vmatmul.mubr.msk.bf16.gmra.mrb[12].mxu1 %vm321_vm2, %v861_v20 }
  0xe5   : > { %v804_v22 = vpop.f32.mrb[0].mxu0 }
  0xe6   : > { %v547_v24 = vmul.f32 %v804_v22, %v950_v21  ;;  %v820_v25 = vpop.f32.mrb[0].mxu1  ;;  %v411_v26 = vpop.f32.mrb[1].mxu0 }
  0xe7   : > { %v563_v27 = vmul.f32 %v820_v25, %v950_v21  ;;  %v545_v28 = vmul.f32 %v950_v21, %v411_v26  ;;  %v475_v29 = vpop.f32.mrb[1].mxu1  ;;  %v805_v30 = vpop.f32.mrb[2].mxu0 }
  0xe8   : > { %v586_v31 = vadd.f32 %v955_v23, %v547_v24  ;;  %v561_v32 = vmul.f32 %v950_v21, %v475_v29  ;;  %v548_v33 = vmul.f32 %v805_v30, %v950_v21  ;;  %v821_v34 = vpop.f32.mrb[2].mxu1  ;;  %v414_v35 = vpop.f32.mrb[3].mxu0 }
  0xe9   : > { %v602_v36 = vadd.f32 %v955_v23, %v563_v27  ;;  %v584_v37 = vadd.f32 %v955_v23, %v545_v28  ;;  %v564_v38 = vmul.f32 %v821_v34, %v950_v21  ;;  %v546_v39 = vmul.f32 %v950_v21, %v414_v35  ;;  %v478_v40 = vpop.f32.mrb[3].mxu1 }
  0xea   : > { %v618_v41 = vmax.f32 %v586_v31, 0.0  ;;  %v600_v42 = vadd.f32 %v955_v23, %v561_v32  ;;  %v587_v43 = vadd.f32 %v955_v23, %v548_v33  ;;  %v562_v44 = vmul.f32 %v950_v21, %v478_v40 }
  0xeb   : > { %v634_v45 = vmax.f32 %v602_v36, 0.0  ;;  %v616_v46 = vmax.f32 %v584_v37, 0.0  ;;  %v603_v47 = vadd.f32 %v955_v23, %v564_v38  ;;  %v585_v48 = vadd.f32 %v955_v23, %v546_v39 }
  0xec   : > { %651 = vst.msk [vmem:[%s967_s5 + $0x10] sm:$0xff] %vm648_vm3, %v618_v41  ;;  %v632_v49 = vmax.f32 %v600_v42, 0.0  ;;  %v619_v50 = vmax.f32 %v587_v43, 0.0  ;;  %v601_v51 = vadd.f32 %v955_v23, %v562_v44 }
  0xed   : > { %667 = vst.msk [vmem:[%s967_s5 + $0x90] sm:$0xff] %vm648_vm3, %v634_v45  ;;  %649 = vst.msk [vmem:[%s967_s5] sm:$0xff] %vm648_vm3, %v616_v46  ;;  %v635_v52 = vmax.f32 %v603_v47, 0.0  ;;  %v617_v53 = vmax.f32 %v585_v48, 0.0  ;;  %v808_v54 = vpop.f32.mrb[4].mxu0 }
  0xee   : > { %665 = vst.msk [vmem:[%s967_s5 + $0x80] sm:$0xff] %vm648_vm3, %v632_v49  ;;  %652 = vst.msk [vmem:[%s967_s5 + $0x18] sm:$0xff] %vm648_vm3, %v619_v50  ;;  %v633_v55 = vmax.f32 %v601_v51, 0.0  ;;  %v551_v56 = vmul.f32 %v808_v54, %v950_v21  ;;  %v824_v57 = vpop.f32.mrb[4].mxu1  ;;  %v427_v58 = vpop.f32.mrb[5].mxu0 }
  0xef   : > { %668 = vst.msk [vmem:[%s967_s5 + $0x98] sm:$0xff] %vm648_vm3, %v635_v52  ;;  %650 = vst.msk [vmem:[%s967_s5 + $0x8] sm:$0xff] %vm648_vm3, %v617_v53  ;;  %v567_v59 = vmul.f32 %v824_v57, %v950_v21  ;;  %v549_v60 = vmul.f32 %v950_v21, %v427_v58  ;;  %v491_v61 = vpop.f32.mrb[5].mxu1  ;;  %v809_v62 = vpop.f32.mrb[6].mxu0 }
  0xf0   : > { %666 = vst.msk [vmem:[%s967_s5 + $0x88] sm:$0xff] %vm648_vm3, %v633_v55  ;;  %v590_v63 = vadd.f32 %v955_v23, %v551_v56  ;;  %v565_v0 = vmul.f32 %v950_v21, %v491_v61  ;;  %v552_v1 = vmul.f32 %v809_v62, %v950_v21  ;;  %v825_v2 = vpop.f32.mrb[6].mxu1  ;;  %v430_v3 = vpop.f32.mrb[7].mxu0 }
  0xf1   : > { %v606_v4 = vadd.f32 %v955_v23, %v567_v59  ;;  %v588_v5 = vadd.f32 %v955_v23, %v549_v60  ;;  %v568_v6 = vmul.f32 %v825_v2, %v950_v21  ;;  %v550_v7 = vmul.f32 %v950_v21, %v430_v3  ;;  %v494_v8 = vpop.f32.mrb[7].mxu1 }
  0xf2   : > { %v622_v9 = vmax.f32 %v590_v63, 0.0  ;;  %v604_v10 = vadd.f32 %v955_v23, %v565_v0  ;;  %v591_v11 = vadd.f32 %v955_v23, %v552_v1  ;;  %v566_v12 = vmul.f32 %v950_v21, %v494_v8 }
  0xf3   : > { %v638_v13 = vmax.f32 %v606_v4, 0.0  ;;  %v620_v14 = vmax.f32 %v588_v5, 0.0  ;;  %v607_v15 = vadd.f32 %v955_v23, %v568_v6  ;;  %v589_v16 = vadd.f32 %v955_v23, %v550_v7 }
  0xf4   : > { %655 = vst.msk [vmem:[%s967_s5 + $0x30] sm:$0xff] %vm648_vm3, %v622_v9  ;;  %v636_v17 = vmax.f32 %v604_v10, 0.0  ;;  %v623_v18 = vmax.f32 %v591_v11, 0.0  ;;  %v605_v19 = vadd.f32 %v955_v23, %v566_v12 }
  0xf5   : > { %671 = vst.msk [vmem:[%s967_s5 + $0xb0] sm:$0xff] %vm648_vm3, %v638_v13  ;;  %653 = vst.msk [vmem:[%s967_s5 + $0x20] sm:$0xff] %vm648_vm3, %v620_v14  ;;  %v639_v20 = vmax.f32 %v607_v15, 0.0  ;;  %v621_v22 = vmax.f32 %v589_v16, 0.0  ;;  %v812_v24 = vpop.f32.mrb[8].mxu0 }
  0xf6   : > { %669 = vst.msk [vmem:[%s967_s5 + $0xa0] sm:$0xff] %vm648_vm3, %v636_v17  ;;  %656 = vst.msk [vmem:[%s967_s5 + $0x38] sm:$0xff] %vm648_vm3, %v623_v18  ;;  %v637_v25 = vmax.f32 %v605_v19, 0.0  ;;  %v555_v26 = vmul.f32 %v812_v24, %v950_v21  ;;  %v828_v27 = vpop.f32.mrb[8].mxu1  ;;  %v443_v28 = vpop.f32.mrb[9].mxu0 }
  0xf7   : > { %672 = vst.msk [vmem:[%s967_s5 + $0xb8] sm:$0xff] %vm648_vm3, %v639_v20  ;;  %654 = vst.msk [vmem:[%s967_s5 + $0x28] sm:$0xff] %vm648_vm3, %v621_v22  ;;  %v571_v29 = vmul.f32 %v828_v27, %v950_v21  ;;  %v553_v30 = vmul.f32 %v950_v21, %v443_v28  ;;  %v507_v31 = vpop.f32.mrb[9].mxu1  ;;  %v813_v32 = vpop.f32.mrb[10].mxu0 }
  0xf8   : > { %670 = vst.msk [vmem:[%s967_s5 + $0xa8] sm:$0xff] %vm648_vm3, %v637_v25  ;;  %v594_v33 = vadd.f32 %v955_v23, %v555_v26  ;;  %v569_v34 = vmul.f32 %v950_v21, %v507_v31  ;;  %v556_v35 = vmul.f32 %v813_v32, %v950_v21  ;;  %v829_v36 = vpop.f32.mrb[10].mxu1  ;;  %v446_v37 = vpop.f32.mrb[11].mxu0 }
  0xf9   : > { %v610_v38 = vadd.f32 %v955_v23, %v571_v29  ;;  %v592_v39 = vadd.f32 %v955_v23, %v553_v30  ;;  %v572_v40 = vmul.f32 %v829_v36, %v950_v21  ;;  %v554_v41 = vmul.f32 %v950_v21, %v446_v37  ;;  %v510_v42 = vpop.f32.mrb[11].mxu1 }
  0xfa   : > { %v626_v43 = vmax.f32 %v594_v33, 0.0  ;;  %v608_v44 = vadd.f32 %v955_v23, %v569_v34  ;;  %v595_v45 = vadd.f32 %v955_v23, %v556_v35  ;;  %v570_v46 = vmul.f32 %v950_v21, %v510_v42 }
  0xfb   : > { %v642_v47 = vmax.f32 %v610_v38, 0.0  ;;  %v624_v48 = vmax.f32 %v592_v39, 0.0  ;;  %v611_v49 = vadd.f32 %v955_v23, %v572_v40  ;;  %v593_v50 = vadd.f32 %v955_v23, %v554_v41 }
  0xfc   : > { %659 = vst.msk [vmem:[%s967_s5 + $0x50] sm:$0xff] %vm648_vm3, %v626_v43  ;;  %v640_v51 = vmax.f32 %v608_v44, 0.0  ;;  %v627_v52 = vmax.f32 %v595_v45, 0.0  ;;  %v609_v53 = vadd.f32 %v955_v23, %v570_v46 }
  0xfd   : > { %675 = vst.msk [vmem:[%s967_s5 + $0xd0] sm:$0xff] %vm648_vm3, %v642_v47  ;;  %657 = vst.msk [vmem:[%s967_s5 + $0x40] sm:$0xff] %vm648_vm3, %v624_v48  ;;  %v643_v54 = vmax.f32 %v611_v49, 0.0  ;;  %v625_v55 = vmax.f32 %v593_v50, 0.0  ;;  %v816_v56 = vpop.f32.mrb[12].mxu0 }
  0xfe   : > { %673 = vst.msk [vmem:[%s967_s5 + $0xc0] sm:$0xff] %vm648_vm3, %v640_v51  ;;  %660 = vst.msk [vmem:[%s967_s5 + $0x58] sm:$0xff] %vm648_vm3, %v627_v52  ;;  %v641_v57 = vmax.f32 %v609_v53, 0.0  ;;  %v559_v58 = vmul.f32 %v816_v56, %v950_v21  ;;  %v832_v59 = vpop.f32.mrb[12].mxu1  ;;  %v459_v60 = vpop.f32.mrb[13].mxu0 }
  0xff   : > { %676 = vst.msk [vmem:[%s967_s5 + $0xd8] sm:$0xff] %vm648_vm3, %v643_v54  ;;  %658 = vst.msk [vmem:[%s967_s5 + $0x48] sm:$0xff] %vm648_vm3, %v625_v55  ;;  %v575_v61 = vmul.f32 %v832_v59, %v950_v21  ;;  %v557_v62 = vmul.f32 %v950_v21, %v459_v60  ;;  %v523_v63 = vpop.f32.mrb[13].mxu1  ;;  %v817_v0 = vpop.f32.mrb[14].mxu0 }
 0x100   : > { %674 = vst.msk [vmem:[%s967_s5 + $0xc8] sm:$0xff] %vm648_vm3, %v641_v57  ;;  %v598_v1 = vadd.f32 %v955_v23, %v559_v58  ;;  %v573_v2 = vmul.f32 %v950_v21, %v523_v63  ;;  %v560_v3 = vmul.f32 %v817_v0, %v950_v21  ;;  %v833_v4 = vpop.f32.mrb[14].mxu1  ;;  %v462_v5 = vpop.f32.mrb[15].mxu0 }
 0x101   : > { %v614_v6 = vadd.f32 %v955_v23, %v575_v61  ;;  %v596_v7 = vadd.f32 %v955_v23, %v557_v62  ;;  %v576_v8 = vmul.f32 %v833_v4, %v950_v21  ;;  %v558_v9 = vmul.f32 %v950_v21, %v462_v5  ;;  %v526_v10 = vpop.f32.mrb[15].mxu1 }
 0x102   : > { %v630_v11 = vmax.f32 %v598_v1, 0.0  ;;  %v612_v12 = vadd.f32 %v955_v23, %v573_v2  ;;  %v599_v13 = vadd.f32 %v955_v23, %v560_v3  ;;  %v574_v14 = vmul.f32 %v950_v21, %v526_v10 }
 0x103   : > { %v646_v15 = vmax.f32 %v614_v6, 0.0  ;;  %v628_v16 = vmax.f32 %v596_v7, 0.0  ;;  %v615_v17 = vadd.f32 %v955_v23, %v576_v8  ;;  %v597_v18 = vadd.f32 %v955_v23, %v558_v9 }
 0x104   : > { %663 = vst.msk [vmem:[%s967_s5 + $0x70] sm:$0xff] %vm648_vm3, %v630_v11  ;;  %v644_v19 = vmax.f32 %v612_v12, 0.0  ;;  %v631_v20 = vmax.f32 %v599_v13, 0.0  ;;  %v613_v22 = vadd.f32 %v955_v23, %v574_v14 }
 0x105   : > { %679 = vst.msk [vmem:[%s967_s5 + $0xf0] sm:$0xff] %vm648_vm3, %v646_v15  ;;  %661 = vst.msk [vmem:[%s967_s5 + $0x60] sm:$0xff] %vm648_vm3, %v628_v16  ;;  %v647_v21 = vmax.f32 %v615_v17, 0.0  ;;  %v629_v24 = vmax.f32 %v597_v18, 0.0 }
 0x106   : > { %677 = vst.msk [vmem:[%s967_s5 + $0xe0] sm:$0xff] %vm648_vm3, %v644_v19  ;;  %664 = vst.msk [vmem:[%s967_s5 + $0x78] sm:$0xff] %vm648_vm3, %v631_v20  ;;  %v645_v25 = vmax.f32 %v613_v22, 0.0 }
 0x107   : > { %680 = vst.msk [vmem:[%s967_s5 + $0xf8] sm:$0xff] %vm648_vm3, %v647_v21  ;;  %662 = vst.msk [vmem:[%s967_s5 + $0x68] sm:$0xff] %vm648_vm3, %v629_v24 }
 0x108   : > { %678 = vst.msk [vmem:[%s967_s5 + $0xe8] sm:$0xff] %vm648_vm3, %v645_v25 }
 0x109 PF: > { %s14_s15 = sadd.s32 1, %s868_s15  }
 0x10a   : > { %p11_p4 = scmp.ge.s32.totalorder %s14_s15, 9  }
 0x10c   :  { %13 = sbr.rel (!%p11_p4) target bundleno = 1 (0x1), region = 66 }

</bundles_post_ra>
